<compile_context>
chip_gen: v5e
topology: v5e:2x2
jax: 0.10.0
libtpu: 0.0.40
codegen_flags: <defaults>
</compile_context>

<pallas_src>
import functools

import jax
import jax.numpy as jnp
from jax.experimental import pallas as pl
from jax.experimental.pallas import tpu as pltpu


def mlp_kernel(x_ref, w1_ref, b1_ref, w2_ref, b2_ref, w3_ref, b3_ref, o_ref, *,
               ew_dtype):
    # x tile: (TB, in_dim) f32 -> bf16 for the MXU (f32 accumulation).
    x = x_ref[...].astype(jnp.bfloat16)

    # Layer 1: Linear + ReLU. Bias-add/ReLU in ew_dtype (bf16 on v6e/v7x, f32 on v5e).
    h1 = jnp.dot(x, w1_ref[...], preferred_element_type=jnp.float32)
    h1 = jnp.maximum(h1.astype(ew_dtype) + b1_ref[...], 0).astype(jnp.bfloat16)

    # Layer 2: Linear + ReLU.
    h2 = jnp.dot(h1, w2_ref[...], preferred_element_type=jnp.float32)
    h2 = jnp.maximum(h2.astype(ew_dtype) + b2_ref[...], 0).astype(jnp.bfloat16)

    # Layer 3 (out_features == 1): MXU matmul against the (H2, 1) weight column and a
    # plain (TB, 1) column store — no XLU reduce, no sublane->lane relayout.
    out = jnp.dot(h2, w3_ref[...], preferred_element_type=jnp.float32)   # (TB, 1)
    o_ref[...] = (out + b3_ref[0]).astype(o_ref.dtype)


def _round_up(x, m):
    return -(-x // m) * m


def _elementwise_dtype():
    # bf16 VALUs exist on v6e/v7x; v5e and older keep elementwise math in f32.
    try:
        kind = jax.devices()[0].device_kind.lower()
    except Exception:
        return jnp.float32
    if any(tag in kind for tag in ("v2", "v3", "v4", "v5")):
        return jnp.float32
    return jnp.bfloat16


def _pick_batch_tile(B, max_tile=4096):
    # Small batches: one 8-row-aligned tile. Large batches: large tiles (amortize the
    # ~0.35us per-grid-step overhead) but keep >= ~8 grid steps so both v7x TCs get
    # work and the x DMA pipeline stays full.
    if B <= 1024:
        return max(8, _round_up(B, 8))
    tb = _round_up(pl.cdiv(B, 8), 512)
    return max(512, min(max_tile, tb))


def mlp_forward(x, params, *, block_batch=None):
    """x: (B, in_dim) f32. Returns (B, 1) f32, matching the PyTorch module."""
    w1, b1, w2, b2, w3, b3 = params
    B, in_dim = x.shape
    H1 = w1.shape[1]
    H2 = w2.shape[1]

    ew_dtype = _elementwise_dtype()
    TB = block_batch if block_batch is not None else _pick_batch_tile(B)
    grid = (pl.cdiv(B, TB),)   # ragged last block; OOB stores are masked by Pallas

    # MXU-feeding weights in bf16 (resident in VMEM); biases in the elementwise dtype.
    w1b = w1.astype(jnp.bfloat16)
    w2b = w2.astype(jnp.bfloat16)
    w3col = w3.T.astype(jnp.bfloat16)            # (H2, 1) column for the N=1 matmul
    b1c = b1.astype(ew_dtype)
    b2c = b2.astype(ew_dtype)

    ew_bytes = jnp.dtype(ew_dtype).itemsize
    flops = 2 * B * (in_dim * H1 + H1 * H2 + H2)
    bytes_accessed = (
        B * in_dim * 4                              # x (f32)
        + (in_dim * H1 + H1 * H2 + H2) * 2          # bf16 weights (incl. w3 column)
        + (H1 + H2) * ew_bytes + 4                  # biases
        + B * 4                                     # output
    )

    kernel = functools.partial(mlp_kernel, ew_dtype=ew_dtype)

    return pl.pallas_call(
        kernel,
        out_shape=jax.ShapeDtypeStruct((B, 1), x.dtype),
        grid=grid,
        in_specs=[
            pl.BlockSpec((TB, in_dim), lambda i: (i, 0)),        # x: batch-tiled, pipelined
            pl.BlockSpec((in_dim, H1), lambda i: (0, 0)),        # w1: resident
            pl.BlockSpec((1, H1), lambda i: (0, 0)),             # b1: resident
            pl.BlockSpec((H1, H2), lambda i: (0, 0)),            # w2: resident
            pl.BlockSpec((1, H2), lambda i: (0, 0)),             # b2: resident
            pl.BlockSpec((H2, 1), lambda i: (0, 0)),             # w3 column: resident
            pl.BlockSpec(memory_space=pltpu.MemorySpace.SMEM),   # b3 scalar in SMEM
        ],
        out_specs=pl.BlockSpec((TB, 1), lambda i: (i, 0)),       # (TB, 1) column store
        compiler_params=pltpu.CompilerParams(
            dimension_semantics=("parallel",),                   # both TCs on v7x
            vmem_limit_bytes=48 * 1024 * 1024,
        ),
        cost_estimate=pl.CostEstimate(
            flops=flops, transcendentals=0, bytes_accessed=bytes_accessed),
    )(x, w1b, b1c, w2b, b2c, w3col, b3)


def init_params(key, in_dim, hidden_dims=(256, 128)):
    # Deterministic synthetic init (PyTorch-like uniform fan-in scaling).
    dims = [in_dim, hidden_dims[0], hidden_dims[1], 1]
    params = []
    for i in range(3):
        key, kw, kb = jax.random.split(key, 3)
        bound = 1.0 / (dims[i] ** 0.5)
        if i < 2:
            # stored as (in_features, out_features) == PyTorch W.T
            w = jax.random.uniform(kw, (dims[i], dims[i + 1]), jnp.float32, -bound, bound)
            b = jax.random.uniform(kb, (1, dims[i + 1]), jnp.float32, -bound, bound)
        else:
            # fc3: PyTorch layout (out=1, in=H2) row vector; scalar bias.
            w = jax.random.uniform(kw, (1, dims[i]), jnp.float32, -bound, bound)
            b = jax.random.uniform(kb, (1,), jnp.float32, -bound, bound)
        params += [w, b]
    return params


def mlp_reference_f32(x, params):
    w1, b1, w2, b2, w3, b3 = params
    h1 = jnp.maximum(x @ w1 + b1, 0.0)
    h2 = jnp.maximum(h1 @ w2 + b2, 0.0)
    return h2 @ w3.T + b3


def mlp_reference_matched(x, params, ew_dtype):
    # Mirrors the kernel's bf16-MXU / ew_dtype-elementwise numerics.
    w1, b1, w2, b2, w3, b3 = params
    h1 = jnp.dot(x.astype(jnp.bfloat16), w1.astype(jnp.bfloat16),
                 preferred_element_type=jnp.float32)
    h1 = jnp.maximum(h1.astype(ew_dtype) + b1.astype(ew_dtype), 0).astype(jnp.bfloat16)
    h2 = jnp.dot(h1, w2.astype(jnp.bfloat16), preferred_element_type=jnp.float32)
    h2 = jnp.maximum(h2.astype(ew_dtype) + b2.astype(ew_dtype), 0).astype(jnp.bfloat16)
    out = jnp.dot(h2, w3.T.astype(jnp.bfloat16), preferred_element_type=jnp.float32)
    return out + b3


if __name__ == "__main__":
    key = jax.random.PRNGKey(0)
    key, kx, kx2 = jax.random.split(key, 3)
    batch, in_dim = 8, 32
    params = init_params(key, in_dim)
    ew_dtype = _elementwise_dtype()

    # Small-shape run (single tile path).
    x = jax.random.normal(kx, (batch, in_dim), jnp.float32)
    out = jax.block_until_ready(mlp_forward(x, params))
    assert out.shape == (batch, 1)
    assert jnp.allclose(out, mlp_reference_matched(x, params, ew_dtype),
                        atol=2e-2, rtol=2e-2)
    assert jnp.allclose(out, mlp_reference_f32(x, params), atol=1e-1, rtol=1e-1)

    # Ragged tiled-grid run (exercises grid=cdiv(B,TB) with a masked partial last tile,
    # multi-step pipelining, and the resident-weight path).
    x_big = jax.random.normal(kx2, (1024 + 40, in_dim), jnp.float32)
    out_big = jax.block_until_ready(mlp_forward(x_big, params, block_batch=512))
    assert out_big.shape == (1024 + 40, 1)
    assert jnp.allclose(out_big, mlp_reference_matched(x_big, params, ew_dtype),
                        atol=2e-2, rtol=2e-2)
    assert jnp.allclose(out_big, mlp_reference_f32(x_big, params), atol=1e-1, rtol=1e-1)

    print("KERNEL_OK")
</pallas_src>

<mosaic_0001>
module attributes {stable_mosaic.version = 11 : i64} {
  func.func @mlp_kernel(%arg0: i32, %arg1: memref<8x32xf32, #tpu.memory_space<vmem>>, %arg2: memref<32x256xbf16, #tpu.memory_space<vmem>>, %arg3: memref<1x256xbf16, #tpu.memory_space<vmem>>, %arg4: memref<256x128xbf16, #tpu.memory_space<vmem>>, %arg5: memref<1x128xbf16, #tpu.memory_space<vmem>>, %arg6: memref<128x1xbf16, #tpu.memory_space<vmem>>, %arg7: memref<1xf32, #tpu.memory_space<smem>>, %arg8: memref<8x1xf32, #tpu.memory_space<vmem>>) attributes {dimension_semantics = [#tpu.dimension_semantics<parallel>], iteration_bounds = array<i64: 1>, scalar_prefetch = 0 : i64, scratch_operands = 0 : i64, tpu.core_type = #tpu.core_type<tc>, window_params = [{transform_indices = @transform_0, window_bounds = array<i64: 8, 32>}, {pipeline_mode = #tpu.pipeline_mode<synchronous>, transform_indices = @transform_1, window_bounds = array<i64: 32, 256>}, {pipeline_mode = #tpu.pipeline_mode<synchronous>, transform_indices = @transform_2, window_bounds = array<i64: 1, 256>}, {pipeline_mode = #tpu.pipeline_mode<synchronous>, transform_indices = @transform_3, window_bounds = array<i64: 256, 128>}, {pipeline_mode = #tpu.pipeline_mode<synchronous>, transform_indices = @transform_4, window_bounds = array<i64: 1, 128>}, {pipeline_mode = #tpu.pipeline_mode<synchronous>, transform_indices = @transform_5, window_bounds = array<i64: 128, 1>}, {transform_indices = @transform_6, window_bounds = array<i64: 1>}, {transform_indices = @transform_7, window_bounds = array<i64: 8, 1>}]} {
    %c0 = arith.constant 0 : index
    %c0_0 = arith.constant 0 : index
    %0 = vector.load %arg1[%c0, %c0_0] : memref<8x32xf32, #tpu.memory_space<vmem>>, vector<8x32xf32>
    %1 = arith.truncf %0 : vector<8x32xf32> to vector<8x32xbf16>
    %c0_1 = arith.constant 0 : index
    %c0_2 = arith.constant 0 : index
    %2 = vector.load %arg2[%c0_1, %c0_2] : memref<32x256xbf16, #tpu.memory_space<vmem>>, vector<32x256xbf16>
    %cst = arith.constant dense<0.000000e+00> : vector<8x256xf32>
    %3 = tpu.matmul %1, %2, %cst {dimension_numbers = #tpu.dot_dimension_numbers<[1], [0], [0], [1], [0, 0, 1, 1], [], []>} : vector<8x32xbf16>, vector<32x256xbf16>, vector<8x256xf32> -> vector<8x256xf32>
    %4 = arith.truncf %3 : vector<8x256xf32> to vector<8x256xbf16>
    %c0_3 = arith.constant 0 : index
    %c0_4 = arith.constant 0 : index
    %5 = vector.load %arg3[%c0_3, %c0_4] : memref<1x256xbf16, #tpu.memory_space<vmem>>, vector<1x256xbf16>
    %6 = vector.broadcast %5 : vector<1x256xbf16> to vector<8x256xbf16>
    %7 = arith.addf %4, %6 : vector<8x256xbf16>
    %cst_5 = arith.constant 0.000000e+00 : bf16
    %8 = vector.broadcast %cst_5 : bf16 to vector<8x256xbf16>
    %9 = arith.maximumf %7, %8 : vector<8x256xbf16>
    %c0_6 = arith.constant 0 : index
    %c0_7 = arith.constant 0 : index
    %10 = vector.load %arg4[%c0_6, %c0_7] : memref<256x128xbf16, #tpu.memory_space<vmem>>, vector<256x128xbf16>
    %cst_8 = arith.constant dense<0.000000e+00> : vector<8x128xf32>
    %11 = tpu.matmul %9, %10, %cst_8 {dimension_numbers = #tpu.dot_dimension_numbers<[1], [0], [0], [1], [0, 0, 1, 1], [], []>} : vector<8x256xbf16>, vector<256x128xbf16>, vector<8x128xf32> -> vector<8x128xf32>
    %12 = arith.truncf %11 : vector<8x128xf32> to vector<8x128xbf16>
    %c0_9 = arith.constant 0 : index
    %c0_10 = arith.constant 0 : index
    %13 = vector.load %arg5[%c0_9, %c0_10] : memref<1x128xbf16, #tpu.memory_space<vmem>>, vector<1x128xbf16>
    %14 = vector.broadcast %13 : vector<1x128xbf16> to vector<8x128xbf16>
    %15 = arith.addf %12, %14 : vector<8x128xbf16>
    %cst_11 = arith.constant 0.000000e+00 : bf16
    %16 = vector.broadcast %cst_11 : bf16 to vector<8x128xbf16>
    %17 = arith.maximumf %15, %16 : vector<8x128xbf16>
    %c0_12 = arith.constant 0 : index
    %c0_13 = arith.constant 0 : index
    %18 = vector.load %arg6[%c0_12, %c0_13] : memref<128x1xbf16, #tpu.memory_space<vmem>>, vector<128x1xbf16>
    %cst_14 = arith.constant dense<0.000000e+00> : vector<8x1xf32>
    %19 = tpu.matmul %17, %18, %cst_14 {dimension_numbers = #tpu.dot_dimension_numbers<[1], [0], [0], [1], [0, 0, 1, 1], [], []>} : vector<8x128xbf16>, vector<128x1xbf16>, vector<8x1xf32> -> vector<8x1xf32>
    %c0_15 = arith.constant 0 : index
    %20 = memref.load %arg7[%c0_15] : memref<1xf32, #tpu.memory_space<smem>>
    %21 = vector.broadcast %20 : f32 to vector<8x1xf32>
    %22 = arith.addf %19, %21 : vector<8x1xf32>
    %c0_16 = arith.constant 0 : index
    %c0_17 = arith.constant 0 : index
    %23 = vector.load %arg8[%c0_16, %c0_17] : memref<8x1xf32, #tpu.memory_space<vmem>>, vector<8x1xf32>
    tpu.vector_store %arg8[%c0_16, %c0_17], %22 {strides = array<i32>} : memref<8x1xf32, #tpu.memory_space<vmem>>, vector<8x1xf32>,
    return
  }
  func.func @transform_0(%arg0: i32) -> (i32, i32) {
    %c0_i32 = arith.constant 0 : i32
    %c0_i32_0 = arith.constant 0 : i32
    return %arg0, %c0_i32 : i32, i32
  }
  func.func @transform_1(%arg0: i32) -> (i32, i32) {
    %c0_i32 = arith.constant 0 : i32
    %c0_i32_0 = arith.constant 0 : i32
    %c0_i32_1 = arith.constant 0 : i32
    return %c0_i32, %c0_i32_0 : i32, i32
  }
  func.func @transform_2(%arg0: i32) -> (i32, i32) {
    %c0_i32 = arith.constant 0 : i32
    %c0_i32_0 = arith.constant 0 : i32
    %c0_i32_1 = arith.constant 0 : i32
    return %c0_i32, %c0_i32_0 : i32, i32
  }
  func.func @transform_3(%arg0: i32) -> (i32, i32) {
    %c0_i32 = arith.constant 0 : i32
    %c0_i32_0 = arith.constant 0 : i32
    %c0_i32_1 = arith.constant 0 : i32
    return %c0_i32, %c0_i32_0 : i32, i32
  }
  func.func @transform_4(%arg0: i32) -> (i32, i32) {
    %c0_i32 = arith.constant 0 : i32
    %c0_i32_0 = arith.constant 0 : i32
    %c0_i32_1 = arith.constant 0 : i32
    return %c0_i32, %c0_i32_0 : i32, i32
  }
  func.func @transform_5(%arg0: i32) -> (i32, i32) {
    %c0_i32 = arith.constant 0 : i32
    %c0_i32_0 = arith.constant 0 : i32
    %c0_i32_1 = arith.constant 0 : i32
    return %c0_i32, %c0_i32_0 : i32, i32
  }
  func.func @transform_6(%arg0: i32) -> i32 {
    %c0_i32 = arith.constant 0 : i32
    %c0_i32_0 = arith.constant 0 : i32
    return %c0_i32 : i32
  }
  func.func @transform_7(%arg0: i32) -> (i32, i32) {
    %c0_i32 = arith.constant 0 : i32
    %c0_i32_0 = arith.constant 0 : i32
    return %arg0, %c0_i32 : i32, i32
  }
}

</mosaic_0001>

<bundles_post_ra>
// kernel: tpu_custom_call.1
= control target key start
LH: loop header
LB: loop body
LE: loop exit
PB: predicated region body
PF: predicated region fallthrough
CT: control target
= control target key end

     0   :  { %13 = vsyncpa [#allocation4], 0  ;;  %s549_s27 = smov [#allocation3]   ;;  %s550_s29 = smov 64   ;;  %s658_s0 = inlined_call_operand.vmem [shape: f32[8,32], index: 0, kind: input, shape index: {}]   ;;  %s659_s1 = inlined_call_operand.vmem [shape: bf16[32,256], index: 1, kind: input, shape index: {}]   ;;  %s660_s2 = inlined_call_operand.vmem [shape: bf16[1,256], index: 2, kind: input, shape index: {}]   ;;  %s661_s3 = inlined_call_operand.hbm [shape: bf16[256,128], index: 3, kind: input, shape index: {}]   ;;  %s662_s4 = inlined_call_operand.vmem [shape: bf16[1,128], index: 4, kind: input, shape index: {}]   ;;  %s663_s5 = inlined_call_operand.vmem [shape: bf16[128,1], index: 5, kind: input, shape index: {}]   ;;  %s664_s6 = inlined_call_operand.<no memory space> [shape: f32[1], index: 6, kind: input, shape index: {}]   ;;  %s665_s7 = inlined_call_operand.vmem [shape: f32[8,1], index: 7, kind: output, shape index: {}]  }
   0x1   :  { %s24_s26 = sshll.u32 %s661_s3, 4  ;;  %s26_s28 = sshll.u32 %s549_s27, 4  ;;  %s25_s26 = int_to_ptr.hbm [resolvable:$true] %s24_s26  ;;  %s27_s28 = int_to_ptr.vmem [resolvable:$true] %s26_s28 }
   0x2   :  { %s551_s30 = smov 4  }
   0x3   :  { %32 = dma.hbm_to_vmem [thread:$0]  %s25_s26, 2048, %s27_s28, [#allocation4], %s550_s29, %s550_s29, %s551_s30  }
   0x4   :  { %547 = dma.done.wait [#allocation4], 2048  }
   0x5   :  { %548 = vsyncadd [#allocation4], 4294965248  ;;  %v388_v0 = vld [vmem:[%s659_s1 + $0x10] sm:$0xf]  ;;  %v495_v1 = vld [vmem:[%s659_s1 + $0x14] sm:$0xf0] }
   0x6   :  { %v380_v2 = vld [vmem:[%s659_s1] sm:$0xf]  ;;  %v389_v3 = vor.u32 %v495_v1, %v388_v0  ;;  %v493_v4 = vld [vmem:[%s659_s1 + $0x4] sm:$0xf0]  ;;  %v494_v5 = vld [vmem:[%s659_s1 + $0x14] sm:$0xf] }
   0x7   :  { %v390_v6 = vld [vmem:[%s659_s1 + $0x18] sm:$0xf0]  ;;  %v381_v7 = vor.u32 %v493_v4, %v380_v2  ;;  %v44_v8 = vld [vmem:[%s658_s0] sm:$0xff]  ;;  %v382_v13 = vld [vmem:[%s659_s1 + $0x8] sm:$0xf0]  ;;  %vm70_vm0 = vcmask 261120  }
   0x8   :  { %80 = vmatpush.bf16.msra.mxu1 %v389_v3  ;;  %v503_v9 = vld [vmem:[#allocation3 + $0x38] sm:$0xff]  ;;  %v393_v11 = vor.u32 %v494_v5, %v390_v6  ;;  %v45_v14 = vpack.c.bf16 %v44_v8, %v44_v8  ;;  %v502_v16 = vld [vmem:[#allocation3 + $0x30] sm:$0xff]  ;;  %v501_v18 = vld [vmem:[#allocation3 + $0x28] sm:$0xff]  ;;  %vm371_vm1 = vcmask 7168  }
   0x9   :  { %v511_v10 = vld [vmem:[#allocation3 + $0x78] sm:$0xff]  ;;  %253 = vmatpush.bf16.msra.mxu2 %v503_v9  ;;  %v510_v17 = vld [vmem:[#allocation3 + $0x70] sm:$0xff]  ;;  %v509_v19 = vld [vmem:[#allocation3 + $0x68] sm:$0xff] }
   0xa   :  { %v492_v12 = vld [vmem:[%s659_s1 + $0x4] sm:$0xf]  ;;  %266 = vmatpush.bf16.msra.mxu3 %v511_v10  ;;  %v500_v20 = vld [vmem:[#allocation3 + $0x20] sm:$0xff]  ;;  %v101_v22 = vld [vmem:[%s660_s2] sm:$0x3]  ;;  %v309_v10 = vstv %s664_s6 }
   0xb   :  { %v385_v15 = vor.u32 %v492_v12, %v382_v13  ;;  %v508_v21 = vld [vmem:[#allocation3 + $0x60] sm:$0xff]  ;;  %103 = vst [vmem:[#allocation1] ss:$9 sm:$0xff] %v101_v22  ;;  %v499_v23 = vld [vmem:[#allocation3 + $0x18] sm:$0xff]  ;;  %v498_v25 = vld [vmem:[#allocation3 + $0x10] sm:$0xff] }
   0xc   :  { %81 = vmatpush.bf16.msra.mxu1 %v381_v7  ;;  %v507_v24 = vld [vmem:[#allocation3 + $0x58] sm:$0xff]  ;;  %v506_v26 = vld [vmem:[#allocation3 + $0x50] sm:$0xff]  ;;  %v497_v27 = vld [vmem:[#allocation3 + $0x8] sm:$0xff] }
   0xd   :  { %254 = vmatpush.bf16.msra.mxu2 %v502_v16  ;;  %v505_v28 = vld [vmem:[#allocation3 + $0x48] sm:$0xff]  ;;  %v496_v29 = vld [vmem:[#allocation3] sm:$0xff]  ;;  %v519_v31 = vld [vmem:[%s663_s5 + $0x38] sm:$0xff] }
   0xe   :  { %267 = vmatpush.bf16.msra.mxu3 %v510_v17  ;;  %v504_v30 = vld [vmem:[#allocation3 + $0x40] sm:$0xff]  ;;  %358 = vmatpush.bf16.msra.mxu0 %v519_v31  ;;  %v518_v32 = vld [vmem:[%s663_s5 + $0x30] sm:$0xff]  ;;  %v516_v35 = vld [vmem:[%s663_s5 + $0x20] sm:$0xff] }
   0xf   :  { %394 = vmatmul.msk.bf16.vlgmr.msra.gmra.mxu1 %vm70_vm0, %v45_v14  ;;  %v517_v34 = vld [vmem:[%s663_s5 + $0x28] sm:$0xff]  ;;  %v515_v41 = vld [vmem:[%s663_s5 + $0x18] sm:$0xff]  ;;  %v514_v57 = vld [vmem:[%s663_s5 + $0x10] sm:$0xff] }
  0x10   :  { %93 = vmatpush.bf16.msrb.mxu1 %v393_v11  ;;  %v513_v58 = vld [vmem:[%s663_s5 + $0x8] sm:$0xff]  ;;  %v512_v59 = vld [vmem:[%s663_s5] sm:$0xff] }
  0x11   :  { %255 = vmatpush.bf16.msra.mxu2 %v501_v18  ;;  %v280_v60 = vld [vmem:[%s662_s4] sm:$0x1] }
  0x12   :  { %268 = vmatpush.bf16.msra.mxu3 %v509_v19  ;;  %359 = vmatpush.bf16.msra.mxu0 %v518_v32  ;;  %v104_v36 = vld [vmem:[#allocation1] sm:$0xff]  ;;  %v105_v37 = vld [vmem:[#allocation1 + $0x9] sm:$0xff]  ;;  %v282_v61 = vpack.i.b16 %v280_v60, %v280_v60 }
  0x13   :  { %v106_v39 = vpack.i.b16 %v104_v36, %v104_v36  ;;  %v109_v40 = vpack.i.b16 %v105_v37, %v105_v37 }
  0x14   :  { %94 = vmatpush.bf16.msrb.mxu1 %v385_v15  ;;  %v284_v62 = vperm.slane %v282_v61, 0 }
  0x15   :  { %256 = vmatpush.bf16.msra.mxu2 %v500_v20  ;;  %v108_v42 = vperm.slane %v106_v39, 0  ;;  %v111_v43 = vperm.slane %v109_v40, 0 }
  0x16   :  { %269 = vmatpush.bf16.msra.mxu3 %v508_v21  ;;  %360 = vmatpush.bf16.msra.mxu0 %v517_v34  ;;  %v286_v3 = vunpack.c.l.bf16 %v284_v62 }
  0x17   :  { %v114_v46 = vunpack.c.l.bf16 %v108_v42  ;;  %v115_v47 = vunpack.c.l.bf16 %v111_v43 }
  0x19   :  { %257 = vmatpush.bf16.msra.mxu2 %v499_v23 }
  0x1a   :  { %270 = vmatpush.bf16.msra.mxu3 %v507_v24  ;;  %361 = vmatpush.bf16.msra.mxu0 %v516_v35 }
  0x1d   :  { %258 = vmatpush.bf16.msra.mxu2 %v498_v25 }
  0x1e   :  { %271 = vmatpush.bf16.msra.mxu3 %v506_v26  ;;  %362 = vmatpush.bf16.msra.mxu0 %v515_v41 }
  0x1f   :  { %395 = vmatmul.msk.bf16.vlgmr.msrb.gmra.mxu1 %vm70_vm0, %v45_v14 }
  0x21   :  { %259 = vmatpush.bf16.msra.mxu2 %v497_v27 }
  0x22   :  { %272 = vmatpush.bf16.msra.mxu3 %v505_v28  ;;  %363 = vmatpush.bf16.msra.mxu0 %v514_v57 }
  0x25   :  { %260 = vmatpush.bf16.msra.mxu2 %v496_v29 }
  0x26   :  { %273 = vmatpush.bf16.msra.mxu3 %v504_v30  ;;  %364 = vmatpush.bf16.msra.mxu0 %v513_v58 }
  0x2a   :  { %365 = vmatpush.bf16.msra.mxu0 %v512_v59 }
  0x8c   :  { %v83_v33 = vpop.f32.mrf.mxu1 }
  0x94   :  { %v85_v38 = vpop.f32.mrf.mxu1 }
  0x9c   :  { %v96_v44 = vpop.f32.mrf.mxu1 }
  0x9d   :  { %v100_v45 = vpack.c.bf16 %v96_v44, %v83_v33 }
  0x9f   :  { %v112_v48 = vunpack.c.l.bf16 %v100_v45  ;;  %v113_v49 = vunpack.c.h.bf16 %v100_v45 }
  0xa1   :  { %v116_v50 = vadd.f32 %v114_v46, %v112_v48  ;;  %v117_v51 = vadd.f32 %v115_v47, %v113_v49 }
  0xa3   :  { %v121_v52 = vmax.f32 %v116_v50, 0.0  ;;  %v122_v53 = vmax.f32 %v117_v51, 0.0 }
  0xa4   :  { %v98_v54 = vpop.f32.mrf.mxu1 }
  0xa5   :  { %v123_v55 = vpack.c.bf16 %v121_v52, %v121_v52  ;;  %v124_v56 = vpack.c.bf16 %v122_v53, %v122_v53 }
  0xa7   :  { %261 = vmatmul.bf16.vlgmr.msra.gmra.mxu2 %v123_v55  ;;  %274 = vmatmul.bf16.vlgmr.msra.gmra.mxu3 %v124_v56 }
 0x12a   :  { %v262_v63 = vpop.f32.mrf.mxu2  ;;  %v275_v0 = vpop.f32.mrf.mxu3 }
 0x12b   :  { %v276_v1 = vadd.f32 %v275_v0, %v262_v63 }
 0x12d   :  { %v279_v2 = vpack.c.bf16 %v276_v1, %v276_v1 }
 0x12f   :  { %v285_v4 = vunpack.c.l.bf16 %v279_v2 }
 0x131   :  { %v287_v5 = vadd.f32 %v286_v3, %v285_v4 }
 0x132   :  { %v264_v6 = vpop.f32.mrf.mxu2  ;;  %v277_v7 = vpop.f32.mrf.mxu3 }
 0x133   :  { %v290_v8 = vmax.f32 %v287_v5, 0.0 }
 0x135   :  { %v291_v9 = vpack.c.bf16 %v290_v8, %v290_v8 }
 0x137   :  { %366 = vmatmul.bf16.vlgmr.msra.gmra.mxu0 %v291_v9 }
 0x1b4   :  { %v367_v11 = vpop.f32.mrf.mxu0 }
 0x1b5   :  { %v368_v12 = vadd.f32 %v367_v11, %v309_v10 }
 0x1b7   :  { %372 = vst.msk [vmem:[%s665_s7] sm:$0xff] %vm371_vm1, %v368_v12 }
 0x1bc   :  { %v369_v13 = vpop.f32.mrf.mxu0 }
 0x1bd   :  { %377 = vsyncpa [#allocation4], 1 }

</bundles_post_ra>
